<compile_context>
chip_gen: v7x
topology: tpu7x:2x2x1
jax: 0.10.0
libtpu: 0.0.40
codegen_flags: <defaults>
</compile_context>

<pallas_src>
import functools

import jax
import jax.numpy as jnp
from jax import lax
from jax.experimental import pallas as pl
from jax.experimental.pallas import tpu as pltpu

F32 = jnp.float32
BF16 = jnp.bfloat16
EPS_BN = 1e-5        # nn.BatchNorm1d default eps
EPS_NORM = 1e-12     # F.normalize default eps


# ------------------------------ fused kernel ------------------------------- #

def _fused_byel_kernel(x_ref, bw_ref, p_ref, o_ref, *, lay, dims):
    d_repr, hidden, proj, class_num, lane = dims

    def rows(name, n=1):
        r = lay[name]                       # static Python int
        return p_ref[r:r + n, :]            # static slice -> (n, lane) f32

    def mm(a, b):
        # bf16 operands, f32 accumulation (MXU native on v6e/v7x; fine on v5e).
        return jnp.dot(a.astype(BF16), b.astype(BF16),
                       preferred_element_type=F32)

    # ---- backbone hidden layer (hook at layer=-2): rep = relu(x @ Wb + bb) ----
    rep = mm(x_ref[...], bw_ref[...]) + rows("bb")[:, :d_repr]
    rep = jnp.maximum(rep, 0.0)                                     # (B, d_repr)

    # ---- MLP(dim, proj, hidden) = Linear -> BatchNorm1d(train) -> ReLU -> Linear
    # Weight blocks are zero-padded to width `lane`, so padded activation
    # columns (>= proj) stay exactly zero all the way through.
    def mlp(h_in, w1, w1_rows, b1, g, beta, w2, b2):
        h = mm(h_in, rows(w1, w1_rows)) + rows(b1)                  # (B, hidden)
        mean = jnp.mean(h, axis=0, keepdims=True)
        var = jnp.mean((h - mean) ** 2, axis=0, keepdims=True)      # biased var (torch BN train)
        h = (h - mean) * lax.rsqrt(var + EPS_BN) * rows(g) + rows(beta)
        h = jnp.maximum(h, 0.0)
        return mm(h, rows(w2, hidden)) + rows(b2)                   # (B, lane), cols >= proj == 0

    # projector (online encoder head) — identical for both views (identity aug)
    proj_o = mlp(rep, "pw1", d_repr, "pb1", "pg", "pbe", "pw2", "pb2")
    # online predictor
    pred_o = mlp(proj_o, "qw1", lane, "qb1", "qg", "qbe", "qw2", "qb2")

    # ---- BYOL loss: loss_fn(x, y) = 2 - 2 * <x/||x||, y/||y||> ---------------
    # target encoder is a fresh deepcopy of the online encoder -> target == proj.
    # label is None => emotion_vector == 0 => pred unchanged.
    # Fused normalization: one rsqrt instead of two + two full-width scalings.
    eps2 = EPS_NORM * EPS_NORM
    ss_pred = jnp.sum(pred_o * pred_o, axis=-1, keepdims=True)
    ss_proj = jnp.sum(proj_o * proj_o, axis=-1, keepdims=True)
    dots = jnp.sum(pred_o * proj_o, axis=-1, keepdims=True)
    cos = dots * lax.rsqrt(jnp.maximum(ss_pred, eps2) *
                           jnp.maximum(ss_proj, eps2))              # (B, 1)
    # loss_one == loss_two (identical views); byol = mean(loss_one + loss_two)
    byol = 2.0 * jnp.mean(2.0 - 2.0 * cos)

    # ---- orthogonality loss: sum(|I - W^T W|), W (proj, class_num) -----------
    # W^T is packed pre-transposed -> standard lane/sublane contraction on MXU.
    # Padded lanes/rows are zero, so extra columns of wtw are exactly 0.
    wtw = jnp.dot(rows("wt", class_num), rows("w", lane),
                  preferred_element_type=F32)                       # (class_num, lane)
    ri = lax.broadcasted_iota(jnp.int32, wtw.shape, 0)
    ci = lax.broadcasted_iota(jnp.int32, wtw.shape, 1)
    eye = (ri == ci).astype(F32)
    loss_w = jnp.sum(jnp.abs(eye - wtw))

    # ---- lane-dense scalar output slab: [byol, loss_w, 0, ..., 0] ------------
    lane_i = lax.broadcasted_iota(jnp.int32, (1, 128), 1)
    o_ref[...] = jnp.where(lane_i == 0, byol,
                           jnp.where(lane_i == 1, loss_w, 0.0))


# ---------------------------- host-side packing ----------------------------- #

def pack_params(params):
    """Pack all small parameters into ONE zero-padded (rows, lane) f32 slab.
    Done once, outside the jitted forward. backbone_w is kept separate and
    stored bf16 at rest (halves the largest DMA)."""
    d_repr = params["backbone_w"].shape[1]
    hidden = params["proj_w1"].shape[1]
    proj = params["proj_w2"].shape[1]
    class_num = params["reg_w"].shape[1]
    lane = hidden
    assert lane >= max(d_repr, proj, class_num)

    def pad(a, n_rows):
        a = a.astype(F32)
        r, c = a.shape
        return jnp.pad(a, ((0, n_rows - r), (0, lane - c)))

    entries = [
        ("pw1", pad(params["proj_w1"], d_repr)),        # (d_repr, lane)
        ("pw2", pad(params["proj_w2"], hidden)),        # (hidden, lane)   lanes >= proj zero
        ("qw1", pad(params["pred_w1"], lane)),          # (lane, lane)     rows  >= proj zero
        ("qw2", pad(params["pred_w2"], hidden)),        # (hidden, lane)   lanes >= proj zero
        ("wt",  pad(params["reg_w"].T, class_num)),     # (class_num, lane) W^T, lanes >= proj zero
        ("w",   pad(params["reg_w"], lane)),            # (lane, lane)      W,  zero-padded
        ("bb",  pad(params["backbone_b"], 1)),
        ("pb1", pad(params["proj_b1"], 1)),
        ("pg",  pad(params["proj_g"], 1)),
        ("pbe", pad(params["proj_beta"], 1)),
        ("pb2", pad(params["proj_b2"], 1)),
        ("qb1", pad(params["pred_b1"], 1)),
        ("qg",  pad(params["pred_g"], 1)),
        ("qbe", pad(params["pred_beta"], 1)),
        ("qb2", pad(params["pred_b2"], 1)),
    ]
    lay, blocks, r = {}, [], 0
    for name, a in entries:
        lay[name] = r
        r += a.shape[0]
        blocks.append(a)
    n_rows = ((r + 7) // 8) * 8
    slab = jnp.concatenate(blocks, axis=0)
    slab = jnp.pad(slab, ((0, n_rows - r), (0, 0)))
    backbone_w = params["backbone_w"].astype(BF16)
    dims = (d_repr, hidden, proj, class_num, lane)
    return backbone_w, slab, lay, dims


# ------------------------------ call wrapper ------------------------------- #

def byel_forward(x, backbone_w, slab, lay, dims):
    """Full forward. Returns (byol_loss, loss_w_sum, classification_loss,
    representation_loss) — the last two are exactly 0 because label=None."""
    B = x.shape[0]

    # TODO(synk): random torchvision augmentations (ColorJitter / RandomGrayscale /
    # RandomHorizontalFlip / GaussianBlur / RandomResizedCrop / Normalize) have no
    # clean Pallas equivalent; augment1/augment2 are treated as identity.
    flat = x.reshape(B, -1)   # NCHW -> (B, C*H*W), matches torch flatten

    kernel = functools.partial(_fused_byel_kernel, lay=lay, dims=dims)
    out = pl.pallas_call(
        kernel,
        out_shape=jax.ShapeDtypeStruct((1, 128), F32),
        grid=(1,),
        in_specs=[
            pl.BlockSpec(flat.shape, lambda i: (0, 0)),
            pl.BlockSpec(backbone_w.shape, lambda i: (0, 0)),
            pl.BlockSpec(slab.shape, lambda i: (0, 0)),
        ],
        out_specs=pl.BlockSpec((1, 128), lambda i: (0, 0)),
        compiler_params=pltpu.CompilerParams(
            dimension_semantics=("arbitrary",)),
    )(flat, backbone_w, slab)

    byol_loss = out[0, 0]
    loss_w_sum = out[0, 1]
    zero = jnp.zeros((), F32)
    return byol_loss, loss_w_sum, zero, zero


# ----------------------------- parameter setup ----------------------------- #

def init_params(key, din, d_repr, proj, hidden, class_num):
    ks = jax.random.split(key, 6)

    def lin(k, i, o, scale=0.02):
        return (jax.random.normal(k, (i, o), F32) * scale).astype(F32)

    p = {}
    # synthetic backbone net: Flatten -> Linear(din, d_repr) -> ReLU -> (head)
    # hidden_layer=-2 hook captures the flattened ReLU output (representation).
    p["backbone_w"] = lin(ks[0], din, d_repr)
    p["backbone_b"] = jnp.zeros((1, d_repr), F32)
    # projector MLP(d_repr, proj, hidden)
    p["proj_w1"] = lin(ks[1], d_repr, hidden)
    p["proj_b1"] = jnp.zeros((1, hidden), F32)
    p["proj_g"] = jnp.ones((1, hidden), F32)
    p["proj_beta"] = jnp.zeros((1, hidden), F32)
    p["proj_w2"] = lin(ks[2], hidden, proj)
    p["proj_b2"] = jnp.zeros((1, proj), F32)
    # online predictor MLP(proj, proj, hidden)
    p["pred_w1"] = lin(ks[3], proj, hidden)
    p["pred_b1"] = jnp.zeros((1, hidden), F32)
    p["pred_g"] = jnp.ones((1, hidden), F32)
    p["pred_beta"] = jnp.zeros((1, hidden), F32)
    p["pred_w2"] = lin(ks[4], hidden, proj)
    p["pred_b2"] = jnp.zeros((1, proj), F32)
    # regressor: W (proj, class_num), orthogonal init. Its BatchNorm outputs
    # feed no loss when label=None, so only W is needed (orthogonality loss).
    w = jax.random.normal(ks[5], (proj, class_num), F32)
    q, _ = jnp.linalg.qr(w)
    p["reg_w"] = q.astype(F32)
    return p


# ---------------------------------- main ------------------------------------ #

if __name__ == "__main__":
    B, Cimg, S = 2, 3, 16              # x: (2, 3, 16, 16) NCHW, as in the module init
    d_repr, proj_size, hidden_size, class_num = 32, 32, 64, 6

    key = jax.random.PRNGKey(0)
    kx, kp = jax.random.split(key)
    x = jax.random.normal(kx, (B, Cimg, S, S), F32)
    params = init_params(kp, Cimg * S * S, d_repr, proj_size, hidden_size,
                         class_num)

    # Pack once, host-side (not inside the jitted forward).
    backbone_w_bf16, slab, lay, dims = pack_params(params)

    fwd = jax.jit(functools.partial(byel_forward, lay=lay, dims=dims))
    out = fwd(x, backbone_w_bf16, slab)
    out = jax.block_until_ready(out)
    byol_loss, loss_w, cls_loss, rep_loss = out
    assert all(bool(jnp.isfinite(v)) for v in (byol_loss, loss_w, cls_loss, rep_loss))
    print("KERNEL_OK")
</pallas_src>

<mosaic_0001>
module attributes {stable_mosaic.version = 11 : i64} {
  func.func @_fused_byel_kernel(%arg0: i32, %arg1: memref<2x768xf32, #tpu.memory_space<vmem>>, %arg2: memref<768x32xbf16, #tpu.memory_space<vmem>>, %arg3: memref<304x64xf32, #tpu.memory_space<vmem>>, %arg4: memref<1x128xf32, #tpu.memory_space<vmem>>) attributes {dimension_semantics = [#tpu.dimension_semantics<arbitrary>], iteration_bounds = array<i64: 1>, scalar_prefetch = 0 : i64, scratch_operands = 0 : i64, tpu.core_type = #tpu.core_type<tc>, window_params = [{pipeline_mode = #tpu.pipeline_mode<synchronous>, transform_indices = @transform_0, window_bounds = array<i64: 2, 768>}, {pipeline_mode = #tpu.pipeline_mode<synchronous>, transform_indices = @transform_1, window_bounds = array<i64: 768, 32>}, {pipeline_mode = #tpu.pipeline_mode<synchronous>, transform_indices = @transform_2, window_bounds = array<i64: 304, 64>}, {pipeline_mode = #tpu.pipeline_mode<synchronous>, transform_indices = @transform_3, window_bounds = array<i64: 1, 128>}]} {
    %c0 = arith.constant 0 : index
    %c0_0 = arith.constant 0 : index
    %0 = vector.load %arg1[%c0, %c0_0] : memref<2x768xf32, #tpu.memory_space<vmem>>, vector<2x768xf32>
    %c0_1 = arith.constant 0 : index
    %c0_2 = arith.constant 0 : index
    %1 = vector.load %arg2[%c0_1, %c0_2] : memref<768x32xbf16, #tpu.memory_space<vmem>>, vector<768x32xbf16>
    %2 = arith.truncf %0 : vector<2x768xf32> to vector<2x768xbf16>
    %cst = arith.constant dense<0.000000e+00> : vector<2x32xf32>
    %3 = tpu.matmul %2, %1, %cst {dimension_numbers = #tpu.dot_dimension_numbers<[1], [0], [0], [1], [0, 0, 1, 1], [], []>} : vector<2x768xbf16>, vector<768x32xbf16>, vector<2x32xf32> -> vector<2x32xf32>
    %c294 = arith.constant 294 : index
    %c0_3 = arith.constant 0 : index
    %4 = vector.load %arg3[%c294, %c0_3] : memref<304x64xf32, #tpu.memory_space<vmem>>, vector<1x64xf32>
    %5 = vector.extract_strided_slice %4 {offsets = [0, 0], sizes = [1, 32], strides = [1, 1]} : vector<1x64xf32> to vector<1x32xf32>
    %6 = vector.broadcast %5 : vector<1x32xf32> to vector<2x32xf32>
    %7 = arith.addf %3, %6 : vector<2x32xf32>
    %cst_4 = arith.constant 0.000000e+00 : f32
    %8 = vector.broadcast %cst_4 : f32 to vector<2x32xf32>
    %9 = arith.maximumf %7, %8 : vector<2x32xf32>
    %c0_5 = arith.constant 0 : index
    %c0_6 = arith.constant 0 : index
    %10 = vector.load %arg3[%c0_5, %c0_6] : memref<304x64xf32, #tpu.memory_space<vmem>>, vector<32x64xf32>
    %11 = arith.truncf %9 : vector<2x32xf32> to vector<2x32xbf16>
    %12 = arith.truncf %10 : vector<32x64xf32> to vector<32x64xbf16>
    %cst_7 = arith.constant dense<0.000000e+00> : vector<2x64xf32>
    %13 = tpu.matmul %11, %12, %cst_7 {dimension_numbers = #tpu.dot_dimension_numbers<[1], [0], [0], [1], [0, 0, 1, 1], [], []>} : vector<2x32xbf16>, vector<32x64xbf16>, vector<2x64xf32> -> vector<2x64xf32>
    %c295 = arith.constant 295 : index
    %c0_8 = arith.constant 0 : index
    %14 = vector.load %arg3[%c295, %c0_8] : memref<304x64xf32, #tpu.memory_space<vmem>>, vector<1x64xf32>
    %15 = vector.broadcast %14 : vector<1x64xf32> to vector<2x64xf32>
    %16 = arith.addf %13, %15 : vector<2x64xf32>
    %cst_9 = arith.constant dense<0.000000e+00> : vector<64xf32>
    %17 = vector.multi_reduction <add>, %16, %cst_9 [0] : vector<2x64xf32> to vector<64xf32>
    %18 = vector.shape_cast %17 : vector<64xf32> to vector<1x64xf32>
    %cst_10 = arith.constant 2.000000e+00 : f32
    %19 = vector.broadcast %cst_10 : f32 to vector<1x64xf32>
    %20 = arith.divf %18, %19 : vector<1x64xf32>
    %21 = vector.broadcast %20 : vector<1x64xf32> to vector<2x64xf32>
    %22 = arith.subf %16, %21 : vector<2x64xf32>
    %23 = arith.mulf %22, %22 : vector<2x64xf32>
    %cst_11 = arith.constant dense<0.000000e+00> : vector<64xf32>
    %24 = vector.multi_reduction <add>, %23, %cst_11 [0] : vector<2x64xf32> to vector<64xf32>
    %25 = vector.shape_cast %24 : vector<64xf32> to vector<1x64xf32>
    %cst_12 = arith.constant 2.000000e+00 : f32
    %26 = vector.broadcast %cst_12 : f32 to vector<1x64xf32>
    %27 = arith.divf %25, %26 : vector<1x64xf32>
    %28 = vector.broadcast %20 : vector<1x64xf32> to vector<2x64xf32>
    %29 = arith.subf %16, %28 : vector<2x64xf32>
    %cst_13 = arith.constant 9.99999974E-6 : f32
    %30 = vector.broadcast %cst_13 : f32 to vector<1x64xf32>
    %31 = arith.addf %27, %30 : vector<1x64xf32>
    %32 = math.rsqrt %31 : vector<1x64xf32>
    %33 = vector.broadcast %32 : vector<1x64xf32> to vector<2x64xf32>
    %34 = arith.mulf %29, %33 : vector<2x64xf32>
    %c296 = arith.constant 296 : index
    %c0_14 = arith.constant 0 : index
    %35 = vector.load %arg3[%c296, %c0_14] : memref<304x64xf32, #tpu.memory_space<vmem>>, vector<1x64xf32>
    %36 = vector.broadcast %35 : vector<1x64xf32> to vector<2x64xf32>
    %37 = arith.mulf %34, %36 : vector<2x64xf32>
    %c297 = arith.constant 297 : index
    %c0_15 = arith.constant 0 : index
    %38 = vector.load %arg3[%c297, %c0_15] : memref<304x64xf32, #tpu.memory_space<vmem>>, vector<1x64xf32>
    %39 = vector.broadcast %38 : vector<1x64xf32> to vector<2x64xf32>
    %40 = arith.addf %37, %39 : vector<2x64xf32>
    %cst_16 = arith.constant 0.000000e+00 : f32
    %41 = vector.broadcast %cst_16 : f32 to vector<2x64xf32>
    %42 = arith.maximumf %40, %41 : vector<2x64xf32>
    %c32 = arith.constant 32 : index
    %c0_17 = arith.constant 0 : index
    %43 = vector.load %arg3[%c32, %c0_17] : memref<304x64xf32, #tpu.memory_space<vmem>>, vector<64x64xf32>
    %44 = arith.truncf %42 : vector<2x64xf32> to vector<2x64xbf16>
    %45 = arith.truncf %43 : vector<64x64xf32> to vector<64x64xbf16>
    %cst_18 = arith.constant dense<0.000000e+00> : vector<2x64xf32>
    %46 = tpu.matmul %44, %45, %cst_18 {dimension_numbers = #tpu.dot_dimension_numbers<[1], [0], [0], [1], [0, 0, 1, 1], [], []>} : vector<2x64xbf16>, vector<64x64xbf16>, vector<2x64xf32> -> vector<2x64xf32>
    %c298 = arith.constant 298 : index
    %c0_19 = arith.constant 0 : index
    %47 = vector.load %arg3[%c298, %c0_19] : memref<304x64xf32, #tpu.memory_space<vmem>>, vector<1x64xf32>
    %48 = vector.broadcast %47 : vector<1x64xf32> to vector<2x64xf32>
    %49 = arith.addf %46, %48 : vector<2x64xf32>
    %c96 = arith.constant 96 : index
    %c0_20 = arith.constant 0 : index
    %50 = vector.load %arg3[%c96, %c0_20] : memref<304x64xf32, #tpu.memory_space<vmem>>, vector<64x64xf32>
    %51 = arith.truncf %49 : vector<2x64xf32> to vector<2x64xbf16>
    %52 = arith.truncf %50 : vector<64x64xf32> to vector<64x64xbf16>
    %cst_21 = arith.constant dense<0.000000e+00> : vector<2x64xf32>
    %53 = tpu.matmul %51, %52, %cst_21 {dimension_numbers = #tpu.dot_dimension_numbers<[1], [0], [0], [1], [0, 0, 1, 1], [], []>} : vector<2x64xbf16>, vector<64x64xbf16>, vector<2x64xf32> -> vector<2x64xf32>
    %c299 = arith.constant 299 : index
    %c0_22 = arith.constant 0 : index
    %54 = vector.load %arg3[%c299, %c0_22] : memref<304x64xf32, #tpu.memory_space<vmem>>, vector<1x64xf32>
    %55 = vector.broadcast %54 : vector<1x64xf32> to vector<2x64xf32>
    %56 = arith.addf %53, %55 : vector<2x64xf32>
    %cst_23 = arith.constant dense<0.000000e+00> : vector<64xf32>
    %57 = vector.multi_reduction <add>, %56, %cst_23 [0] : vector<2x64xf32> to vector<64xf32>
    %58 = vector.shape_cast %57 : vector<64xf32> to vector<1x64xf32>
    %cst_24 = arith.constant 2.000000e+00 : f32
    %59 = vector.broadcast %cst_24 : f32 to vector<1x64xf32>
    %60 = arith.divf %58, %59 : vector<1x64xf32>
    %61 = vector.broadcast %60 : vector<1x64xf32> to vector<2x64xf32>
    %62 = arith.subf %56, %61 : vector<2x64xf32>
    %63 = arith.mulf %62, %62 : vector<2x64xf32>
    %cst_25 = arith.constant dense<0.000000e+00> : vector<64xf32>
    %64 = vector.multi_reduction <add>, %63, %cst_25 [0] : vector<2x64xf32> to vector<64xf32>
    %65 = vector.shape_cast %64 : vector<64xf32> to vector<1x64xf32>
    %cst_26 = arith.constant 2.000000e+00 : f32
    %66 = vector.broadcast %cst_26 : f32 to vector<1x64xf32>
    %67 = arith.divf %65, %66 : vector<1x64xf32>
    %68 = vector.broadcast %60 : vector<1x64xf32> to vector<2x64xf32>
    %69 = arith.subf %56, %68 : vector<2x64xf32>
    %cst_27 = arith.constant 9.99999974E-6 : f32
    %70 = vector.broadcast %cst_27 : f32 to vector<1x64xf32>
    %71 = arith.addf %67, %70 : vector<1x64xf32>
    %72 = math.rsqrt %71 : vector<1x64xf32>
    %73 = vector.broadcast %72 : vector<1x64xf32> to vector<2x64xf32>
    %74 = arith.mulf %69, %73 : vector<2x64xf32>
    %c300 = arith.constant 300 : index
    %c0_28 = arith.constant 0 : index
    %75 = vector.load %arg3[%c300, %c0_28] : memref<304x64xf32, #tpu.memory_space<vmem>>, vector<1x64xf32>
    %76 = vector.broadcast %75 : vector<1x64xf32> to vector<2x64xf32>
    %77 = arith.mulf %74, %76 : vector<2x64xf32>
    %c301 = arith.constant 301 : index
    %c0_29 = arith.constant 0 : index
    %78 = vector.load %arg3[%c301, %c0_29] : memref<304x64xf32, #tpu.memory_space<vmem>>, vector<1x64xf32>
    %79 = vector.broadcast %78 : vector<1x64xf32> to vector<2x64xf32>
    %80 = arith.addf %77, %79 : vector<2x64xf32>
    %cst_30 = arith.constant 0.000000e+00 : f32
    %81 = vector.broadcast %cst_30 : f32 to vector<2x64xf32>
    %82 = arith.maximumf %80, %81 : vector<2x64xf32>
    %c160 = arith.constant 160 : index
    %c0_31 = arith.constant 0 : index
    %83 = vector.load %arg3[%c160, %c0_31] : memref<304x64xf32, #tpu.memory_space<vmem>>, vector<64x64xf32>
    %84 = arith.truncf %82 : vector<2x64xf32> to vector<2x64xbf16>
    %85 = arith.truncf %83 : vector<64x64xf32> to vector<64x64xbf16>
    %cst_32 = arith.constant dense<0.000000e+00> : vector<2x64xf32>
    %86 = tpu.matmul %84, %85, %cst_32 {dimension_numbers = #tpu.dot_dimension_numbers<[1], [0], [0], [1], [0, 0, 1, 1], [], []>} : vector<2x64xbf16>, vector<64x64xbf16>, vector<2x64xf32> -> vector<2x64xf32>
    %c302 = arith.constant 302 : index
    %c0_33 = arith.constant 0 : index
    %87 = vector.load %arg3[%c302, %c0_33] : memref<304x64xf32, #tpu.memory_space<vmem>>, vector<1x64xf32>
    %88 = vector.broadcast %87 : vector<1x64xf32> to vector<2x64xf32>
    %89 = arith.addf %86, %88 : vector<2x64xf32>
    %90 = arith.mulf %89, %89 : vector<2x64xf32>
    %cst_34 = arith.constant dense<0.000000e+00> : vector<2xf32>
    %91 = vector.multi_reduction <add>, %90, %cst_34 [1] : vector<2x64xf32> to vector<2xf32>
    %92 = vector.shape_cast %91 : vector<2xf32> to vector<2x1xf32>
    %93 = arith.mulf %49, %49 : vector<2x64xf32>
    %cst_35 = arith.constant dense<0.000000e+00> : vector<2xf32>
    %94 = vector.multi_reduction <add>, %93, %cst_35 [1] : vector<2x64xf32> to vector<2xf32>
    %95 = vector.shape_cast %94 : vector<2xf32> to vector<2x1xf32>
    %96 = arith.mulf %89, %49 : vector<2x64xf32>
    %cst_36 = arith.constant dense<0.000000e+00> : vector<2xf32>
    %97 = vector.multi_reduction <add>, %96, %cst_36 [1] : vector<2x64xf32> to vector<2xf32>
    %98 = vector.shape_cast %97 : vector<2xf32> to vector<2x1xf32>
    %cst_37 = arith.constant 1.000000e-24 : f32
    %99 = vector.broadcast %cst_37 : f32 to vector<2x1xf32>
    %100 = arith.maximumf %92, %99 : vector<2x1xf32>
    %cst_38 = arith.constant 1.000000e-24 : f32
    %101 = vector.broadcast %cst_38 : f32 to vector<2x1xf32>
    %102 = arith.maximumf %95, %101 : vector<2x1xf32>
    %103 = arith.mulf %100, %102 : vector<2x1xf32>
    %104 = math.rsqrt %103 : vector<2x1xf32>
    %105 = arith.mulf %98, %104 : vector<2x1xf32>
    %cst_39 = arith.constant 2.000000e+00 : f32
    %106 = vector.broadcast %cst_39 : f32 to vector<2x1xf32>
    %107 = arith.mulf %106, %105 : vector<2x1xf32>
    %cst_40 = arith.constant 2.000000e+00 : f32
    %108 = vector.broadcast %cst_40 : f32 to vector<2x1xf32>
    %109 = arith.subf %108, %107 : vector<2x1xf32>
    %110 = vector.shape_cast %109 : vector<2x1xf32> to vector<1x2x1xf32>
    %cst_41 = arith.constant dense<0.000000e+00> : vector<1xf32>
    %111 = vector.multi_reduction <add>, %110, %cst_41 [1, 2] : vector<1x2x1xf32> to vector<1xf32>
    %112 = vector.shape_cast %111 : vector<1xf32> to vector<1x1x1xf32>
    %113 = vector.extract %112[0, 0, 0] : f32 from vector<1x1x1xf32>
    %cst_42 = arith.constant 2.000000e+00 : f32
    %114 = arith.divf %113, %cst_42 : f32
    %cst_43 = arith.constant 2.000000e+00 : f32
    %115 = arith.mulf %cst_43, %114 : f32
    %c224 = arith.constant 224 : index
    %c0_44 = arith.constant 0 : index
    %116 = vector.load %arg3[%c224, %c0_44] : memref<304x64xf32, #tpu.memory_space<vmem>>, vector<6x64xf32>
    %c230 = arith.constant 230 : index
    %c0_45 = arith.constant 0 : index
    %117 = vector.load %arg3[%c230, %c0_45] : memref<304x64xf32, #tpu.memory_space<vmem>>, vector<64x64xf32>
    %cst_46 = arith.constant dense<0.000000e+00> : vector<6x64xf32>
    %118 = tpu.matmul %116, %117, %cst_46 {dimension_numbers = #tpu.dot_dimension_numbers<[1], [0], [0], [1], [0, 0, 1, 1], [], []>} : vector<6x64xf32>, vector<64x64xf32>, vector<6x64xf32> -> vector<6x64xf32>
    %119 = tpu.iota {dimensions = array<i32: 0>} : vector<6x64xi32>
    %120 = tpu.iota {dimensions = array<i32: 1>} : vector<6x64xi32>
    %121 = arith.cmpi eq, %119, %120 : vector<6x64xi32>
    %122 = arith.extui %121 : vector<6x64xi1> to vector<6x64xi32>
    %123 = arith.sitofp %122 : vector<6x64xi32> to vector<6x64xf32>
    %124 = arith.subf %123, %118 : vector<6x64xf32>
    %125 = math.absf %124 : vector<6x64xf32>
    %126 = vector.shape_cast %125 : vector<6x64xf32> to vector<1x6x64xf32>
    %cst_47 = arith.constant dense<0.000000e+00> : vector<1xf32>
    %127 = vector.multi_reduction <add>, %126, %cst_47 [1, 2] : vector<1x6x64xf32> to vector<1xf32>
    %128 = vector.shape_cast %127 : vector<1xf32> to vector<1x1x1xf32>
    %129 = vector.extract %128[0, 0, 0] : f32 from vector<1x1x1xf32>
    %130 = tpu.iota {dimensions = array<i32: 1>} : vector<1x128xi32>
    %c0_i32 = arith.constant 0 : i32
    %131 = vector.broadcast %c0_i32 : i32 to vector<1x128xi32>
    %132 = arith.cmpi eq, %130, %131 : vector<1x128xi32>
    %c1_i32 = arith.constant 1 : i32
    %133 = vector.broadcast %c1_i32 : i32 to vector<1x128xi32>
    %134 = arith.cmpi eq, %130, %133 : vector<1x128xi32>
    %cst_48 = arith.constant 0.000000e+00 : f32
    %135 = vector.broadcast %129 : f32 to vector<1x128xf32>
    %136 = vector.broadcast %cst_48 : f32 to vector<1x128xf32>
    %137 = arith.select %134, %135, %136 : vector<1x128xi1>, vector<1x128xf32>
    %138 = vector.broadcast %115 : f32 to vector<1x128xf32>
    %139 = arith.select %132, %138, %137 : vector<1x128xi1>, vector<1x128xf32>
    %c0_49 = arith.constant 0 : index
    %c0_50 = arith.constant 0 : index
    %140 = vector.load %arg4[%c0_49, %c0_50] : memref<1x128xf32, #tpu.memory_space<vmem>>, vector<1x128xf32>
    tpu.vector_store %arg4[%c0_49, %c0_50], %139 {strides = array<i32>} : memref<1x128xf32, #tpu.memory_space<vmem>>, vector<1x128xf32>,
    return
  }
  func.func @transform_0(%arg0: i32) -> (i32, i32) {
    %c0_i32 = arith.constant 0 : i32
    %c0_i32_0 = arith.constant 0 : i32
    %c0_i32_1 = arith.constant 0 : i32
    return %c0_i32, %c0_i32_0 : i32, i32
  }
  func.func @transform_1(%arg0: i32) -> (i32, i32) {
    %c0_i32 = arith.constant 0 : i32
    %c0_i32_0 = arith.constant 0 : i32
    %c0_i32_1 = arith.constant 0 : i32
    return %c0_i32, %c0_i32_0 : i32, i32
  }
  func.func @transform_2(%arg0: i32) -> (i32, i32) {
    %c0_i32 = arith.constant 0 : i32
    %c0_i32_0 = arith.constant 0 : i32
    %c0_i32_1 = arith.constant 0 : i32
    return %c0_i32, %c0_i32_0 : i32, i32
  }
  func.func @transform_3(%arg0: i32) -> (i32, i32) {
    %c0_i32 = arith.constant 0 : i32
    %c0_i32_0 = arith.constant 0 : i32
    %c0_i32_1 = arith.constant 0 : i32
    return %c0_i32, %c0_i32_0 : i32, i32
  }
}

</mosaic_0001>

<bundles_post_ra>
// kernel: byel_forward.1
= control target key start
LH: loop header
LB: loop body
LE: loop exit
PB: predicated region body
PF: predicated region fallthrough
CT: control target
= control target key end

     0   :  { %v1318_v21 = vmov 1983009808   ;;  %v119_v23 = vlaneseq  ;;  %vm1320_vm0 = vmmov 0   ;;  %vm578_vm1 = vcmask 261120   ;;  %s1682_s1 = inlined_call_operand.vmem [shape: bf16[768,32], index: 1, kind: input, shape index: {}]   ;;  %s1683_s0 = inlined_call_operand.vmem [shape: f32[2,768], index: 0, kind: input, shape index: {}]   ;;  %s1684_s2 = inlined_call_operand.vmem [shape: f32[304,64], index: 2, kind: input, shape index: {}]   ;;  %s1685_s3 = inlined_call_operand.vmem [shape: f32[1,128], index: 3, kind: output, shape index: {}]  }
   0x1   :  { %v1263_v0 = vld [vmem:[%s1682_s1 + $0x40] sm:$0xff]   ;;  %v1267_v4 = vld [vmem:[%s1682_s1 + $0x48] sm:$0xff]   ;;  %v1271_v8 = vld [vmem:[%s1682_s1 + $0x50] sm:$0xff]   ;;  %v117_v22 = vunpack.c.l.s4 %v1318_v21  ;;  %vm622_vm2 = vcmask 517120   ;;  %vm676_vm3 = vcmask 523264   ;;  %vm1001_vm5 = vcmask 521216  }
   0x2   :  { %v1264_v1 = vld [vmem:[%s1682_s1] sm:$0xff]   ;;  %1087 = vmatprep.subr.bf16.mxu0 %v1263_v0  ;;  %v1268_v5 = vld [vmem:[%s1682_s1 + $0x8] sm:$0xff]   ;;  %v1272_v9 = vld [vmem:[%s1682_s1 + $0x10] sm:$0xff]   ;;  %v1418_v29 = vshrl.u32 %v119_v23, 7  ;;  %vm895_vm6 = vcmask 1024  }
   0x3   :  { %v1265_v2 = vld [vmem:[%s1682_s1 + $0xc0] sm:$0xff]   ;;  %1088 = vmatpush3.bf16.msra.mxu0 %v1264_v1  ;;  %v1269_v6 = vld [vmem:[%s1682_s1 + $0xc8] sm:$0xff]   ;;  %v1273_v10 = vld [vmem:[%s1682_s1 + $0xd0] sm:$0xff]   ;;  %v118_v28 = vunpack.c.0.s8 %v117_v22 }
   0x4   :  { %v1266_v3 = vld [vmem:[%s1682_s1 + $0x80] sm:$0xff]   ;;  %1109 = vmatprep.subr.bf16.mxu1 %v1265_v2  ;;  %1089 = vmatprep.subr.bf16.mxu0 %v1267_v4  ;;  %v1270_v7 = vld [vmem:[%s1682_s1 + $0x88] sm:$0xff]   ;;  %v1274_v11 = vld [vmem:[%s1682_s1 + $0x90] sm:$0xff]  }
   0x5   :  { %1110 = vmatpush3.bf16.msra.mxu1 %v1266_v3  ;;  %v1275_v12 = vld [vmem:[%s1682_s1 + $0x58] sm:$0xff]   ;;  %v1279_v16 = vld [vmem:[%s1682_s1 + $0x60] sm:$0xff]   ;;  %v1283_v20 = vld [vmem:[%s1682_s1 + $0x68] sm:$0xff]   ;;  %v121_v34 = vsub.s32 %v118_v28, %v1418_v29 }
   0x6   :  { %1111 = vmatprep.subr.bf16.mxu1 %v1269_v6  ;;  %v1276_v13 = vld [vmem:[%s1682_s1 + $0x18] sm:$0xff]   ;;  %v1280_v17 = vld [vmem:[%s1682_s1 + $0x20] sm:$0xff]   ;;  %v1284_v24 = vld [vmem:[%s1682_s1 + $0x28] sm:$0xff]  }
   0x7   :  { %1090 = vmatpush3.bf16.msra.mxu0 %v1268_v5  ;;  %v1277_v14 = vld [vmem:[%s1682_s1 + $0xd8] sm:$0xff]   ;;  %v1281_v18 = vld [vmem:[%s1682_s1 + $0xe0] sm:$0xff]   ;;  %v1285_v25 = vld [vmem:[%s1682_s1 + $0xe8] sm:$0xff]  }
   0x8   :  { %1091 = vmatprep.subr.bf16.mxu0 %v1271_v8  ;;  %v1278_v15 = vld [vmem:[%s1682_s1 + $0x98] sm:$0xff]   ;;  %v1282_v19 = vld [vmem:[%s1682_s1 + $0xa0] sm:$0xff]   ;;  %v1286_v26 = vld [vmem:[%s1682_s1 + $0xa8] sm:$0xff]  }
   0x9   :  { %1112 = vmatpush3.bf16.msra.mxu1 %v1270_v7  ;;  %v1287_v27 = vld [vmem:[%s1682_s1 + $0x70] sm:$0xff]   ;;  %v1291_v33 = vld [vmem:[%s1682_s1 + $0x78] sm:$0xff]   ;;  %v15_v37 = vld [vmem:[%s1683_s0] sm:$0xff]  ;;  %v1319_v7 = vmov 0.0  }
   0xa   :  { %1113 = vmatprep.subr.bf16.mxu1 %v1273_v10  ;;  %v1288_v30 = vld [vmem:[%s1682_s1 + $0x30] sm:$0xff]   ;;  %v1292_v35 = vld [vmem:[%s1682_s1 + $0x38] sm:$0xff]   ;;  %v122_v38 = vrot.slane %v15_v37, %v121_v34  ;;  %v115_v40 = vcombine.high %v15_v37, %v15_v37  ;;  %v1295_v41 = vld [vmem:[%s1682_s1 + $0x140] sm:$0xff]  }
   0xb   :  { %1092 = vmatpush3.bf16.msra.mxu0 %v1272_v9  ;;  %v1289_v31 = vld [vmem:[%s1682_s1 + $0xf0] sm:$0xff]   ;;  %v1293_v36 = vld [vmem:[%s1682_s1 + $0xf8] sm:$0xff]   ;;  %v1297_v47 = vld [vmem:[%s1682_s1 + $0x100] sm:$0xff]  }
   0xc   :  { %1093 = vmatprep.subr.bf16.mxu0 %v1275_v12  ;;  %v1290_v32 = vld [vmem:[%s1682_s1 + $0xb0] sm:$0xff]   ;;  %v1294_v39 = vld [vmem:[%s1682_s1 + $0xb8] sm:$0xff]   ;;  %v130_v42 = vcombine.high %v122_v38, %v122_v38  ;;  %v129_v43 = vrot.slane %v115_v40, %v121_v34  ;;  %v146_v44 = vpack.c.bf16 %v122_v38, %v122_v38  ;;  %v1298_v49 = vld [vmem:[%s1682_s1 + $0x148] sm:$0xff]  }
   0xd   :  { %1114 = vmatpush3.bf16.msra.mxu1 %v1274_v11  ;;  %v1299_v51 = vld [vmem:[%s1682_s1 + $0x108] sm:$0xff]   ;;  %v1300_v52 = vld [vmem:[%s1682_s1 + $0x150] sm:$0xff]   ;;  %v1302_v54 = vld [vmem:[%s1682_s1 + $0x158] sm:$0xff]  }
   0xe   :  { %1115 = vmatprep.subr.bf16.mxu1 %v1277_v14  ;;  %v147_v45 = vpack.c.bf16 %v130_v42, %v130_v42  ;;  %v131_v46 = vcombine.high %v129_v43, %v129_v43  ;;  %v148_v48 = vpack.c.bf16 %v129_v43, %v129_v43  ;;  %v1301_v53 = vld [vmem:[%s1682_s1 + $0x110] sm:$0xff]   ;;  %v1303_v55 = vld [vmem:[%s1682_s1 + $0x118] sm:$0xff]   ;;  %v1023_v56 = vld.sshfl [vmem:[%s1683_s0 + $0x8] sm:$0x33 pattern:$0x76325410] }
   0xf   :  { %1094 = vmatpush3.bf16.msra.mxu0 %v1276_v13  ;;  %v1304_v57 = vld [vmem:[%s1682_s1 + $0x160] sm:$0xff]   ;;  %v139_v58 = vcombine.high %v1023_v56, %v1023_v56  ;;  %v1306_v61 = vld [vmem:[%s1682_s1 + $0x168] sm:$0xff]   ;;  %v1308_v63 = vld [vmem:[%s1682_s1 + $0x170] sm:$0xff]   ;;  %v150_v3 = vpack.c.bf16 %v1023_v56, %v1023_v56 }
  0x10   :  { %1095 = vmatprep.subr.bf16.mxu0 %v1279_v16  ;;  %477 = vmatprep.mubr.bf16.mxu0 %v147_v45  ;;  %v149_v50 = vpack.c.bf16 %v131_v46, %v131_v46  ;;  %v1305_v60 = vld [vmem:[%s1682_s1 + $0x120] sm:$0xff]   ;;  %v1307_v62 = vld [vmem:[%s1682_s1 + $0x128] sm:$0xff]   ;;  %v1309_v0 = vld [vmem:[%s1682_s1 + $0x130] sm:$0xff]  }
  0x11   :  { %1116 = vmatpush3.bf16.msra.mxu1 %v1278_v15  ;;  %v151_v59 = vpack.c.bf16 %v139_v58, %v139_v58  ;;  %v1310_v1 = vld [vmem:[%s1682_s1 + $0x178] sm:$0xff]   ;;  %v566_v4 = vld [vmem:[%s1684_s2] sm:$0xff]  ;;  %v567_v5 = vld [vmem:[%s1684_s2 + $0x8] sm:$0xff] }
  0x12   :  { %1117 = vmatprep.subr.bf16.mxu1 %v1281_v18  ;;  %517 = vmatprep.mubr.bf16.mxu1 %v149_v50  ;;  %v1311_v2 = vld [vmem:[%s1682_s1 + $0x138] sm:$0xff]   ;;  %v571_v6 = vpack.c.bf16 %v567_v5, %v566_v4  ;;  %v568_v8 = vld [vmem:[%s1684_s2 + $0x10] sm:$0xff]  ;;  %v1024_v12 = vld [vmem:[%s1684_s2 + $0x126] ss:$0 sm:$0xff] }
  0x13   :  { %1096 = vmatpush3.bf16.msra.mxu0 %v1280_v17  ;;  %v569_v9 = vld [vmem:[%s1684_s2 + $0x18] sm:$0xff]  ;;  %v658_v34 = vld [vmem:[%s1684_s2 + $0x20] sm:$0xff]  ;;  %v660_v37 = vld [vmem:[%s1684_s2 + $0x30] sm:$0xff] }
  0x14   :  { %1097 = vmatprep.subr.bf16.mxu0 %v1283_v20  ;;  %v572_v10 = vpack.c.bf16 %v569_v9, %v568_v8  ;;  %v661_v38 = vld [vmem:[%s1684_s2 + $0x38] sm:$0xff]  ;;  %v662_v40 = vld [vmem:[%s1684_s2 + $0x40] sm:$0xff]  ;;  %v664_v43 = vld [vmem:[%s1684_s2 + $0x50] sm:$0xff] }
  0x15   :  { %1118 = vmatpush3.bf16.msra.mxu1 %v1282_v19  ;;  %v1073_v46 = vld [vmem:[%s1684_s2 + $0x127] ss:$0 sm:$0xff]  ;;  %v1075_v9 = vld [vmem:[%s1684_s2 + $0x128] ss:$0 sm:$0xff] }
  0x16   :  { %1119 = vmatprep.subr.bf16.mxu1 %v1285_v25 }
  0x17   :  { %1098 = vmatpush3.bf16.msra.mxu0 %v1284_v24 }
  0x18   :  { %1099 = vmatprep.subr.bf16.mxu0 %v1287_v27 }
  0x19   :  { %1120 = vmatpush3.bf16.msra.mxu1 %v1286_v26 }
  0x1a   :  { %1121 = vmatprep.subr.bf16.mxu1 %v1289_v31 }
  0x1b   :  { %1100 = vmatpush3.bf16.msra.mxu0 %v1288_v30 }
  0x1c   :  { %1101 = vmatprep.subr.bf16.mxu0 %v1291_v33 }
  0x1d   :  { %1122 = vmatpush3.bf16.msra.mxu1 %v1290_v32 }
  0x1e   :  { %1123 = vmatprep.subr.bf16.mxu1 %v1293_v36 }
  0x1f   :  { %1102 = vmatpush3.bf16.msra.mxu0 %v1292_v35  ;;  %v659_v35 = vld [vmem:[%s1684_s2 + $0x28] sm:$0xff] }
  0x20   :  { %1131 = vmatprep.subr.bf16.mxu0 %v1295_v41  ;;  %v667_v36 = vpack.c.bf16 %v659_v35, %v658_v34  ;;  %v663_v41 = vld [vmem:[%s1684_s2 + $0x48] sm:$0xff] }
  0x21   :  { %1124 = vmatpush3.bf16.msra.mxu1 %v1294_v39  ;;  %v668_v39 = vpack.c.bf16 %v661_v38, %v660_v37  ;;  %v669_v42 = vpack.c.bf16 %v663_v41, %v662_v40  ;;  %v815_v37 = vld [vmem:[%s1684_s2 + $0xa0] sm:$0xff]  ;;  %v816_v38 = vld [vmem:[%s1684_s2 + $0xa8] sm:$0xff]  ;;  %v817_v40 = vld [vmem:[%s1684_s2 + $0xb0] sm:$0xff] }
  0x22   :  { %478 = vmatmul.mubr.bf16.vlgmr.msra.gmra.mrb[0].mxu0 %v146_v44  ;;  %1180 = vmatprep.subr.bf16.mxu1 %v1319_v7  ;;  %v665_v44 = vld [vmem:[%s1684_s2 + $0x58] sm:$0xff] }
  0x23   :  { %1132 = vmatpush3.bf16.msra.mxu0 %v1297_v47  ;;  %557 = vmatprep.mubr.bf16.mxu0 %v151_v59  ;;  %v670_v45 = vpack.c.bf16 %v665_v44, %v664_v43  ;;  %v818_v41 = vld [vmem:[%s1684_s2 + $0xb8] sm:$0xff]  ;;  %v819_v43 = vld [vmem:[%s1684_s2 + $0xc0] sm:$0xff]  ;;  %v820_v44 = vld [vmem:[%s1684_s2 + $0xc8] sm:$0xff] }
  0x24   :  { %518 = vmatmul.mubr.bf16.vlgmr.msra.gmra.mrb[0].mxu1 %v148_v48  ;;  %1133 = vmatprep.subr.bf16.mxu0 %v1298_v49 }
  0x25   :  { %1181 = vmatpush3.bf16.msra.mxu1 %v571_v6  ;;  %1184 = vmatprep.mubr.msk.bf16.mxu1 %vm1320_vm0, %v1319_v7 }
  0x26   :  { %1182 = vmatprep.subr.bf16.mxu1 %v1319_v7 }
  0x27   :  { %1134 = vmatpush3.bf16.msra.mxu0 %v1299_v51 }
  0x28   :  { %1135 = vmatprep.subr.bf16.mxu0 %v1300_v52 }
  0x29   :  { %1183 = vmatpush3.bf16.msra.mxu1 %v572_v10 }
  0x2a   :  { %1188 = vmatprep.subr.bf16.mxu1 %v1319_v7 }
  0x2b   :  { %1136 = vmatpush3.bf16.msra.mxu0 %v1301_v53 }
  0x2c   :  { %1137 = vmatprep.subr.bf16.mxu0 %v1302_v54 }
  0x2f   :  { %1138 = vmatpush3.bf16.msra.mxu0 %v1303_v55 }
  0x30   :  { %1139 = vmatprep.subr.bf16.mxu0 %v1304_v57 }
  0x33   :  { %1140 = vmatpush3.bf16.msra.mxu0 %v1305_v60 }
  0x34   :  { %1141 = vmatprep.subr.bf16.mxu0 %v1306_v61 }
  0x37   :  { %1142 = vmatpush3.bf16.msra.mxu0 %v1307_v62 }
  0x38   :  { %1143 = vmatprep.subr.bf16.mxu0 %v1308_v63 }
  0x3b   :  { %1144 = vmatpush3.bf16.msra.mxu0 %v1309_v0 }
  0x3c   :  { %1145 = vmatprep.subr.bf16.mxu0 %v1310_v1 }
  0x3f   :  { %1146 = vmatpush3.bf16.msra.mxu0 %v1311_v2 }
  0x40   :  { %1212 = vmatprep.subr.bf16.mxu0 %v1319_v7 }
  0x42   :  { %558 = vmatmul.mubr.bf16.vlgmr.msra.gmra.mrb[4].mxu0 %v150_v3 }
  0x43   :  { %1220 = vmatprep.mubr.msk.bf16.mxu0 %vm1320_vm0, %v1319_v7 }
  0xf5   :  { %v1103_v11 = vpop.f32.mrb[0].mxu0 }
  0xf6   :  { %v1104_v13 = vpop.f32.mrb[1].mxu0 }
  0xf7   :  { %v1105_v14 = vadd.f32 %v1104_v13, %v1103_v11  ;;  %v1106_v15 = vpop.f32.mrb[2].mxu0  ;;  %v1125_v16 = vpop.f32.mrb[0].mxu1  ;;  %v1076_v11 = vld [vmem:[%s1684_s2 + $0x129] ss:$0 sm:$0xff] }
  0xf8   :  { %v1107_v17 = vpop.f32.mrb[3].mxu0  ;;  %v1126_v18 = vpop.f32.mrb[1].mxu1  ;;  %v721_v15 = vld [vmem:[%s1684_s2 + $0x68] sm:$0xff] }
  0xf9   :  { %v480_v19 = vadd.f32 %v1105_v14, %v1024_v12  ;;  %v1127_v20 = vadd.f32 %v1126_v18, %v1125_v16  ;;  %v1128_v21 = vpop.f32.mrb[2].mxu1  ;;  %v720_v14 = vld [vmem:[%s1684_s2 + $0x60] sm:$0xff] }
  0xfa   :  { %v1129_v22 = vpop.f32.mrb[3].mxu1  ;;  %v729_v17 = vpack.c.bf16 %v721_v15, %v720_v14 }
  0xfb   :  { %v520_v24 = vadd.f32 %v1127_v20, %v480_v19  ;;  %v722_v19 = vld [vmem:[%s1684_s2 + $0x70] sm:$0xff]  ;;  %v723_v20 = vld [vmem:[%s1684_s2 + $0x78] sm:$0xff]  ;;  %v724_v22 = vld [vmem:[%s1684_s2 + $0x80] sm:$0xff] }
  0xfc   :  { %v730_v21 = vpack.c.bf16 %v723_v20, %v722_v19 }
 0x115   :  { %v1147_v25 = vpop.f32.mrb[4].mxu0 }
 0x116   :  { %v1148_v26 = vpop.f32.mrb[5].mxu0 }
 0x117   :  { %v1149_v27 = vadd.f32 %v1148_v26, %v1147_v25  ;;  %v1150_v28 = vpop.f32.mrb[6].mxu0  ;;  %v726_v26 = vld [vmem:[%s1684_s2 + $0x90] sm:$0xff] }
 0x118   :  { %v1151_v30 = vpop.f32.mrb[7].mxu0 }
 0x119   :  { %v560_v31 = vadd.f32 %v1149_v27, %v520_v24  ;;  %v725_v24 = vld [vmem:[%s1684_s2 + $0x88] sm:$0xff]  ;;  %v727_v27 = vld [vmem:[%s1684_s2 + $0x98] sm:$0xff] }
 0x11a   :  { %v731_v25 = vpack.c.bf16 %v725_v24, %v724_v22  ;;  %v732_v28 = vpack.c.bf16 %v727_v27, %v726_v26  ;;  %v1077_v30 = vld [vmem:[%s1684_s2 + $0x12a] ss:$0 sm:$0xff]  ;;  %v1081_v27 = vld [vmem:[%s1684_s2 + $0x12c] ss:$0 sm:$0xff] }
 0x11b   :  { %v565_v32 = vmax.f32 %v560_v31, 0.0 }
 0x11d   :  { %v570_v33 = vpack.c.bf16 %v565_v32, %v565_v32 }
 0x11f   :  { %1185 = vmatmul.mubr.msk.bf16.vlgmr.msra.gmra.mrb[4].mxu1 %vm578_vm1, %v570_v33 }
 0x120   :  { %1196 = vmatprep.mubr.msk.bf16.mxu1 %vm1320_vm0, %v1319_v7  ;;  %1189 = vmatpush3.bf16.msra.mxu1 %v667_v36 }
 0x121   :  { %1190 = vmatprep.subr.bf16.mxu1 %v1319_v7 }
 0x124   :  { %1191 = vmatpush3.bf16.msra.mxu1 %v668_v39  ;;  %v824_v39 = vpack.c.bf16 %v816_v38, %v815_v37 }
 0x125   :  { %1192 = vmatprep.subr.bf16.mxu1 %v1319_v7 }
 0x126   :  { %1213 = vmatpush3.bf16.msra.mxu0 %v824_v39 }
 0x127   :  { %1214 = vmatprep.subr.bf16.mxu0 %v1319_v7 }
 0x128   :  { %1193 = vmatpush3.bf16.msra.mxu1 %v669_v42  ;;  %v825_v42 = vpack.c.bf16 %v818_v41, %v817_v40 }
 0x129   :  { %1194 = vmatprep.subr.bf16.mxu1 %v1319_v7 }
 0x12a   :  { %1215 = vmatpush3.bf16.msra.mxu0 %v825_v42 }
 0x12b   :  { %1216 = vmatprep.subr.bf16.mxu0 %v1319_v7 }
 0x12c   :  { %1195 = vmatpush3.bf16.msra.mxu1 %v670_v45  ;;  %v826_v45 = vpack.c.bf16 %v820_v44, %v819_v43 }
 0x12d   :  { %1200 = vmatprep.subr.bf16.mxu1 %v1319_v7 }
 0x12e   :  { %1217 = vmatpush3.bf16.msra.mxu0 %v826_v45 }
 0x12f   :  { %1218 = vmatprep.subr.bf16.mxu0 %v1319_v7 }
 0x1f2   :  { %v616_v47 = vpop.f32.mrb[4].mxu1 }
 0x1f3   :  { %v617_v48 = vadd.f32 %v1073_v46, %v616_v47  ;;  %v1186_v49 = vpop.f32.mrb[5].mxu1  ;;  %v821_v46 = vld [vmem:[%s1684_s2 + $0xd0] sm:$0xff]  ;;  %v822_v47 = vld [vmem:[%s1684_s2 + $0xd8] sm:$0xff] }
 0x1f4   :  { %v619_v50 = vpop.f32.mrb[6].mxu1  ;;  %v911_v49 = vld [vmem:[%s1684_s2 + $0xe6] sm:$0xff] }
 0x1f5   :  { %v623_v51 = vsel %vm622_vm2, %v617_v48, 0.0  ;;  %v1187_v52 = vpop.f32.mrb[7].mxu1  ;;  %v912_v50 = vld [vmem:[%s1684_s2 + $0xee] sm:$0xff] }
 0x1f6   :  { %v624_v53 = vrot.slane %v623_v51, 4  ;;  %v1321_v52 = vmov 0.0|0.0  }
 0x1f8   :  { %v625_v54 = vadd.f32 %v624_v53, %v623_v51  ;;  %v913_v51 = vld [vmem:[%s1684_s2 + $0xf6] sm:$0xff]  ;;  %v1244_v53 = vpack.c.bf16 %v912_v50, %v911_v49  ;;  %v995_v49 = vand.u32 127, %v119_v23 }
 0x1fa   :  { %v626_v55 = vrot.slane %v625_v54, 2  ;;  %vm996_vm4 = vcmp.eq.s32.totalorder %v1418_v29, %v995_v49  ;;  %vm1013_vm7 = vcmp.eq.s32.totalorder %v995_v49, 1  ;;  %vm1012_vm8 = vcmp.eq.s32.totalorder %v995_v49, 0 }
 0x1fc   :  { %v627_v56 = vadd.f32 %v626_v55, %v625_v54  ;;  %v914_v54 = vld [vmem:[%s1684_s2 + $0xfe] sm:$0xff] }
 0x1fd   :  { %v1247_v55 = vpack.c.bf16 %v914_v54, %v913_v51  ;;  %v1086_v51 = vsel %vm996_vm4, 1.0, %v1319_v7 }
 0x1fe   :  { %v628_v57 = vrot.slane %v627_v56, 1 }
 0x200   :  { %v629_v58 = vadd.f32 %v628_v57, %v627_v56  ;;  %v915_v56 = vld [vmem:[%s1684_s2 + $0x106] sm:$0xff]  ;;  %v916_v57 = vld [vmem:[%s1684_s2 + $0x10e] sm:$0xff] }
 0x202   :  { %v631_v59 = vmul.f32 0.5, %v629_v58  ;;  %v1250_v58 = vpack.c.bf16 %v916_v57, %v915_v56 }
 0x204   :  { %v632_v60 = vsub.f32 %v617_v48, %v631_v59  ;;  %v827_v48 = vpack.c.bf16 %v822_v47, %v821_v46  ;;  %v917_v59 = vld [vmem:[%s1684_s2 + $0x116] sm:$0xff] }
 0x206   :  { %v633_v61 = vmul.f32 %v632_v60, %v632_v60  ;;  %1219 = vmatpush3.bf16.msra.mxu0 %v827_v48 }
 0x208   :  { %v634_v62 = vsel %vm622_vm2, %v633_v61, 0.0 }
 0x209   :  { %v635_v63 = vrot.slane %v634_v62, 4 }
 0x20b   :  { %v636_v0 = vadd.f32 %v635_v63, %v634_v62  ;;  %v910_v62 = vld [vmem:[%s1684_s2 + $0xe0] sm:$0x3f]  ;;  %v1079_v63 = vld [vmem:[%s1684_s2 + $0x12b] ss:$0 sm:$0xff] }
 0x20d   :  { %v637_v1 = vrot.slane %v636_v0, 2 }
 0x20f   :  { %v638_v2 = vadd.f32 %v637_v1, %v636_v0 }
 0x211   :  { %v639_v3 = vrot.slane %v638_v2, 1 }
 0x213   :  { %v640_v4 = vadd.f32 %v639_v3, %v638_v2 }
 0x215   :  { %v641_v5 = vmul.f32 0.5, %v640_v4 }
 0x217   :  { %v642_v6 = vadd.f32 1e-05, %v641_v5 }
 0x219   :  { %1312 = vrsqrt.f32 %v642_v6 }
 0x223   :  { %v1313_v8 = vpop.eup %1312 }
 0x224   :  { %v644_v10 = vmul.f32 %v1313_v8, %v632_v60  ;;  %v918_v60 = vld [vmem:[%s1684_s2 + $0x11e] sm:$0xff] }
 0x225   :  { %v1253_v61 = vpack.c.bf16 %v918_v60, %v917_v59 }
 0x226   :  { %v650_v12 = vmul.f32 %v1075_v9, %v644_v10 }
 0x228   :  { %v656_v13 = vadd.f32 %v1076_v11, %v650_v12 }
 0x22a   :  { %v657_v16 = vmax.f32 %v656_v13, 0.0 }
 0x22c   :  { %v666_v18 = vpack.c.bf16 %v657_v16, %v657_v16 }
 0x22e   :  { %1197 = vmatmul.mubr.msk.bf16.vlgmr.msra.gmra.mrb[8].mxu1 %vm676_vm3, %v666_v18 }
 0x22f   :  { %1201 = vmatpush3.bf16.msra.mxu1 %v729_v17  ;;  %1208 = vmatprep.mubr.msk.bf16.mxu1 %vm1320_vm0, %v1319_v7 }
 0x230   :  { %1202 = vmatprep.subr.bf16.mxu1 %v1319_v7 }
 0x233   :  { %1203 = vmatpush3.bf16.msra.mxu1 %v730_v21 }
 0x234   :  { %1204 = vmatprep.subr.bf16.mxu1 %v1319_v7 }
 0x237   :  { %1205 = vmatpush3.bf16.msra.mxu1 %v731_v25 }
 0x238   :  { %1206 = vmatprep.subr.bf16.mxu1 %v1319_v7 }
 0x23b   :  { %1207 = vmatpush3.bf16.msra.mxu1 %v732_v28 }
 0x23c   :  { %1243 = vmatprep.subr.bf16.mxu1 %v1321_v52 }
 0x301   :  { %v714_v31 = vpop.f32.mrb[8].mxu1 }
 0x302   :  { %v1593_v32 = vadd.f32 %v1077_v30, %v714_v31  ;;  %v1198_v33 = vpop.f32.mrb[9].mxu1  ;;  %v1082_v30 = vld [vmem:[%s1684_s2 + $0x12d] ss:$0 sm:$0xff] }
 0x303   :  { %v717_v34 = vpop.f32.mrb[10].mxu1 }
 0x304   :  { %v728_v35 = vpack.c.bf16 %v1593_v32, %v1593_v32  ;;  %v1199_v36 = vpop.f32.mrb[11].mxu1  ;;  %v880_v46 = vmul.f32 %v1593_v32, %v1593_v32 }
 0x305   :  { %v1083_v36 = vld [vmem:[%s1684_s2 + $0x12e] ss:$0 sm:$0xff] }
 0x306   :  { %1209 = vmatmul.mubr.msk.bf16.vlgmr.msra.gmra.mrb[12].mxu1 %vm676_vm3, %v728_v35  ;;  %v881_v47 = vsel %vm622_vm2, %v880_v46, 0.0 }
 0x307   :  { %1240 = vmatprep.mubr.msk.f32.mxu1 %vm1320_vm0, %v1319_v7  ;;  %1245 = vmatpush3.bf16.msra.mxu1 %v1244_v53 }
 0x308   :  { %1246 = vmatprep.subr.bf16.mxu1 %v1321_v52 }
 0x30b   :  { %1248 = vmatpush3.bf16.msra.mxu1 %v1247_v55 }
 0x30c   :  { %1249 = vmatprep.subr.bf16.mxu1 %v1321_v52 }
 0x30f   :  { %1251 = vmatpush3.bf16.msra.mxu1 %v1250_v58 }
 0x310   :  { %1252 = vmatprep.subr.bf16.mxu1 %v1321_v52 }
 0x313   :  { %1254 = vmatpush3.bf16.msra.mxu1 %v1253_v61 }
 0x316   :  { %1241 = vmatmul.mubr.msk.f32.vlgmr.msra.gmra.mrb[16].mxu1 %vm676_vm3, %v910_v62 }
 0x3d9   :  { %v775_v0 = vpop.f32.mrb[12].mxu1 }
 0x3da   :  { %v776_v1 = vadd.f32 %v1079_v63, %v775_v0  ;;  %v1210_v2 = vpop.f32.mrb[13].mxu1 }
 0x3db   :  { %v778_v3 = vpop.f32.mrb[14].mxu1 }
 0x3dc   :  { %v781_v4 = vsel %vm622_vm2, %v776_v1, 0.0  ;;  %v1211_v5 = vpop.f32.mrb[15].mxu1 }
 0x3dd   :  { %v782_v6 = vrot.slane %v781_v4, 4 }
 0x3df   :  { %v783_v8 = vadd.f32 %v782_v6, %v781_v4 }
 0x3e1   :  { %v784_v9 = vrot.slane %v783_v8, 2 }
 0x3e3   :  { %v785_v10 = vadd.f32 %v784_v9, %v783_v8 }
 0x3e5   :  { %v786_v11 = vrot.slane %v785_v10, 1 }
 0x3e7   :  { %v787_v12 = vadd.f32 %v786_v11, %v785_v10 }
 0x3e9   :  { %v788_v13 = vmul.f32 0.5, %v787_v12  ;;  %v988_v48 = vpop.f32.mrb[16].mxu1 }
 0x3ea   :  { %v1242_v50 = vpop.f32.mrb[17].mxu1  ;;  %v999_v52 = vsub.f32 %v1086_v51, %v988_v48 }
 0x3eb   :  { %v789_v14 = vsub.f32 %v776_v1, %v788_v13 }
 0x3ec   :  { %v1000_v53 = vand.u32 2147483647, %v999_v52 }
 0x3ed   :  { %v790_v15 = vmul.f32 %v789_v14, %v789_v14 }
 0x3ee   :  { %v1002_v54 = vsel %vm1001_vm5, %v1000_v53, 0.0 }
 0x3ef   :  { %v791_v16 = vsel %vm622_vm2, %v790_v15, 0.0 }
 0x3f0   :  { %v792_v17 = vrot.slane %v791_v16, 4 }
 0x3f2   :  { %v793_v18 = vadd.f32 %v792_v17, %v791_v16 }
 0x3f4   :  { %v794_v19 = vrot.slane %v793_v18, 2 }
 0x3f6   :  { %v795_v20 = vadd.f32 %v794_v19, %v793_v18 }
 0x3f8   :  { %v796_v21 = vrot.slane %v795_v20, 1 }
 0x3fa   :  { %v797_v22 = vadd.f32 %v796_v21, %v795_v20 }
 0x3fc   :  { %v798_v24 = vmul.f32 0.5, %v797_v22 }
 0x3fe   :  { %v799_v25 = vadd.f32 1e-05, %v798_v24 }
 0x400   :  { %1314 = vrsqrt.f32 %v799_v25 }
 0x40a   :  { %v1315_v26 = vpop.eup %1314 }
 0x40b   :  { %v801_v28 = vmul.f32 %v1315_v26, %v789_v14 }
 0x40d   :  { %v807_v31 = vmul.f32 %v1081_v27, %v801_v28 }
 0x40f   :  { %v813_v33 = vadd.f32 %v1082_v30, %v807_v31 }
 0x411   :  { %v814_v34 = vmax.f32 %v813_v33, 0.0 }
 0x413   :  { %v823_v35 = vpack.c.bf16 %v814_v34, %v814_v34 }
 0x415   :  { %1221 = vmatmul.mubr.msk.bf16.vlgmr.msra.gmra.mrb[8].mxu0 %vm676_vm3, %v823_v35 }
 0x4e8   :  { %v870_v37 = vpop.f32.mrb[8].mxu0 }
 0x4e9   :  { %v871_v38 = vadd.f32 %v1083_v36, %v870_v37  ;;  %v1222_v39 = vpop.f32.mrb[9].mxu0 }
 0x4ea   :  { %v873_v40 = vpop.f32.mrb[10].mxu0 }
 0x4eb   :  { %v1223_v41 = vpop.f32.mrb[11].mxu0  ;;  %v884_v42 = vmul.f32 %v871_v38, %v1593_v32  ;;  %v876_v43 = vmul.f32 %v871_v38, %v871_v38 }
 0x4ed   :  { %v885_v44 = vsel %vm622_vm2, %v884_v42, 0.0  ;;  %v877_v45 = vsel %vm622_vm2, %v876_v43, 0.0 }
 0x4ee   :  { %886 = vadd.xlane.f32.xlu1 %v885_v44  ;;  %878 = vadd.xlane.f32.xlu0 %v877_v45 }
 0x4f2   :  { %882 = vadd.xlane.f32.xlu0 %v881_v47 }
 0x4f6   :  { %1003 = vadd.xlane.f32.xlu0 %v1002_v54 }
 0x57b   :  { %v879_v55 = vpop.xlane.xlu0 %878  ;;  %v887_v60 = vpop.xlane.xlu1 %886 }
 0x57c   :  { %v888_v56 = vmax.f32 %v879_v55, 1e-24 }
 0x57f   :  { %v883_v32 = vpop.xlane.xlu0 %882 }
 0x580   :  { %v889_v57 = vmax.f32 %v883_v32, 1e-24 }
 0x582   :  { %v890_v58 = vmul.f32 %v889_v57, %v888_v56 }
 0x583   :  { %v1004_v7 = vpop.xlane.xlu0 %1003 }
 0x584   :  { %1316 = vrsqrt.f32 %v890_v58  ;;  %v1005_v63 = vrot.slane %v1004_v7, 4 }
 0x586   :  { %v1006_v0 = vadd.f32 %v1005_v63, %v1004_v7 }
 0x588   :  { %v1007_v1 = vrot.slane %v1006_v0, 2 }
 0x58a   :  { %v1008_v5 = vadd.f32 %v1007_v1, %v1006_v0 }
 0x58c   :  { %v1009_v9 = vrot.slane %v1008_v5, 1 }
 0x58e   :  { %v1317_v59 = vpop.eup %1316  ;;  %v1010_v12 = vadd.f32 %v1009_v9, %v1008_v5 }
 0x58f   :  { %v892_v61 = vmul.f32 %v1317_v59, %v887_v60 }
 0x591   :  { %v893_v23 = vmul.f32 2.0, %v892_v61 }
 0x593   :  { %v894_v62 = vsub.f32 2.0, %v893_v23 }
 0x595   :  { %v896_v29 = vsel %vm895_vm6, %v894_v62, 0.0 }
 0x596   :  { %897 = vadd.xlane.f32.xlu1 %v896_v29 }
 0x623   :  { %v898_v2 = vpop.xlane.xlu1 %897 }
 0x624   :  { %v899_v3 = vrot.slane %v898_v2, 4 }
 0x626   :  { %v900_v4 = vadd.f32 %v899_v3, %v898_v2 }
 0x628   :  { %v901_v6 = vrot.slane %v900_v4, 2 }
 0x62a   :  { %v902_v8 = vadd.f32 %v901_v6, %v900_v4 }
 0x62c   :  { %v903_v10 = vrot.slane %v902_v8, 1 }
 0x62e   :  { %v904_v11 = vadd.f32 %v903_v10, %v902_v8 }
 0x630   :  { %1255 = vpush %v904_v11 }
 0x631   :  { %1257 = vpush %v1010_v12 }
 0x661   :  { %s1256_s2 = spop %1255 }
 0x662   :  { %s908_s7 = smul.f32 0.5, %s1256_s2  ;;  %s1258_s8 = spop %1257 }
 0x663   :  { %v1014_v13 = vstv %s1258_s8 }
 0x664   :  { %s909_s9 = smul.f32 2.0, %s908_s7  ;;  %v1015_v15 = vsel %vm1013_vm7, %v1014_v13, 0.0 }
 0x666   :  { %v1016_v14 = vstv %s909_s9 }
 0x667   :  { %v1017_v16 = vsel %vm1012_vm8, %v1016_v14, %v1015_v15 }
 0x668   :  { %1018 = vst [vmem:[%s1685_s3] sm:$0x1] %v1017_v16 }

</bundles_post_ra>
